<compile_context>
chip_gen: v6e
topology: v6e:2x2x1
jax: 0.10.0
libtpu: 0.0.40
codegen_flags: <defaults>
</compile_context>

<pallas_src>
import jax
import jax.numpy as jnp
from jax.experimental import pallas as pl
from jax.experimental.pallas import tpu as pltpu

LATENT_DIM = 128
COND_DIM = 512
IN_DIM = LATENT_DIM + COND_DIM   # 640
HIDDEN_DIM = 256


def _round_up(x, m):
    return (x + m - 1) // m * m


def diffusion_kernel(z_ref, c_ref, w1_ref, b1_ref, w2_ref, b2_ref, o_ref):
    # In-kernel bf16 cast of the f32 activation tiles (hides under the DMA
    # stream; avoids a separate wrapper-side convert pass over HBM).
    z16 = z_ref[...].astype(jnp.bfloat16)
    c16 = c_ref[...].astype(jnp.bfloat16)

    # First linear on concat([z, cond]) as a split matmul against static row
    # slices of W1 (split at row 128 is tile-aligned -> free view).
    h = jnp.dot(z16, w1_ref[:LATENT_DIM, :],
                preferred_element_type=jnp.float32)
    h = h + jnp.dot(c16, w1_ref[LATENT_DIM:, :],
                    preferred_element_type=jnp.float32)

    # Bias (broadcast over batch) + ReLU, kept in f32 (v5e VPU has no bf16).
    h = jnp.maximum(h + b1_ref[...], 0.0)

    # Second linear: bf16 operands, f32 accumulation, f32 bias.
    o = jnp.dot(h.astype(w2_ref.dtype), w2_ref[...],
                preferred_element_type=jnp.float32) + b2_ref[...]
    o_ref[...] = o.astype(o_ref.dtype)


def diffusion_forward(z_noisy, cond, w1, b1, w2, b2, *, block_b=2048):
    """z_noisy: (B, 128), cond: (B, 512); w1: (640, 256), b1: (256,),
    w2: (256, 128), b2: (128,).  Returns (B, 128) float32."""
    B = z_noisy.shape[0]

    # Batch tile: multiple of 8 (f32 sublane), capped at block_b.  No padding:
    # the last tile may be ragged (masked OOB reads / stores).
    TB = min(block_b, _round_up(B, 8))
    # If everything fits in one tile but the batch is sizable, split into two
    # tiles so the "parallel" axis can be sharded across v7x's 2 TensorCores.
    if pl.cdiv(B, TB) < 2 and B >= 512:
        TB = _round_up(pl.cdiv(B, 2), 8)
    grid = (pl.cdiv(B, TB),)

    # Activations stay f32 (cast to bf16 inside the kernel).  Weights are cast
    # once to bf16 here (tiny, VMEM-resident across the grid).
    z32 = z_noisy.astype(jnp.float32)
    c32 = cond.astype(jnp.float32)
    w1_16 = w1.astype(jnp.bfloat16)          # passed whole; split inside kernel
    w2_16 = w2.astype(jnp.bfloat16)
    b1_2d = b1.reshape(1, HIDDEN_DIM).astype(jnp.float32)
    b2_2d = b2.reshape(1, LATENT_DIM).astype(jnp.float32)

    flops = 2 * B * (IN_DIM * HIDDEN_DIM + HIDDEN_DIM * LATENT_DIM)
    bytes_accessed = (
        B * (IN_DIM * 4 + LATENT_DIM * 4)                      # f32 acts in/out
        + (IN_DIM * HIDDEN_DIM + HIDDEN_DIM * LATENT_DIM) * 2  # bf16 weights
        + (HIDDEN_DIM + LATENT_DIM) * 4                        # f32 biases
    )

    out = pl.pallas_call(
        diffusion_kernel,
        out_shape=jax.ShapeDtypeStruct((B, LATENT_DIM), jnp.float32),
        grid_spec=pltpu.PrefetchScalarGridSpec(
            num_scalar_prefetch=0,
            grid=grid,
            in_specs=[
                pl.BlockSpec((TB, LATENT_DIM), lambda i: (i, 0)),      # z tile
                pl.BlockSpec((TB, COND_DIM), lambda i: (i, 0)),        # cond tile
                pl.BlockSpec((IN_DIM, HIDDEN_DIM), lambda i: (0, 0)),  # W1 (resident)
                pl.BlockSpec((1, HIDDEN_DIM), lambda i: (0, 0)),       # b1
                pl.BlockSpec((HIDDEN_DIM, LATENT_DIM), lambda i: (0, 0)),  # W2
                pl.BlockSpec((1, LATENT_DIM), lambda i: (0, 0)),       # b2
            ],
            out_specs=pl.BlockSpec((TB, LATENT_DIM), lambda i: (i, 0)),
        ),
        compiler_params=pltpu.CompilerParams(
            dimension_semantics=("parallel",),
            # ~13 MiB live at TB=2048 (double-buffered f32 tiles + bf16
            # weights); 48 MiB leaves headroom on v7x's 64 MiB physical VMEM.
            vmem_limit_bytes=48 * 1024 * 1024,
        ),
        cost_estimate=pl.CostEstimate(
            flops=flops, transcendentals=0, bytes_accessed=bytes_accessed),
    )(z32, c32, w1_16, b1_2d, w2_16, b2_2d)

    return out


def reference_forward(z_noisy, cond, w1, b1, w2, b2):
    x = jnp.concatenate([z_noisy, cond], axis=-1)
    h = jnp.maximum(x @ w1 + b1, 0.0)
    return h @ w2 + b2


if __name__ == "__main__":
    key = jax.random.PRNGKey(0)
    k_z, k_c, k_w1, k_b1, k_w2, k_b2 = jax.random.split(key, 6)

    B = 8  # small test batch

    z_noisy = jax.random.normal(k_z, (B, LATENT_DIM), dtype=jnp.float32)
    cond = jax.random.normal(k_c, (B, COND_DIM), dtype=jnp.float32)

    # Deterministic PyTorch-like init: uniform(-1/sqrt(fan_in), 1/sqrt(fan_in)).
    fan1 = IN_DIM
    fan2 = HIDDEN_DIM
    w1 = jax.random.uniform(k_w1, (fan1, HIDDEN_DIM), jnp.float32,
                            -1.0 / jnp.sqrt(fan1), 1.0 / jnp.sqrt(fan1))
    b1 = jax.random.uniform(k_b1, (HIDDEN_DIM,), jnp.float32,
                            -1.0 / jnp.sqrt(fan1), 1.0 / jnp.sqrt(fan1))
    w2 = jax.random.uniform(k_w2, (HIDDEN_DIM, LATENT_DIM), jnp.float32,
                            -1.0 / jnp.sqrt(fan2), 1.0 / jnp.sqrt(fan2))
    b2 = jax.random.uniform(k_b2, (LATENT_DIM,), jnp.float32,
                            -1.0 / jnp.sqrt(fan2), 1.0 / jnp.sqrt(fan2))

    out = diffusion_forward(z_noisy, cond, w1, b1, w2, b2)
    out = jax.block_until_ready(out)

    ref = reference_forward(z_noisy, cond, w1, b1, w2, b2)
    assert out.shape == (B, LATENT_DIM)
    # bf16 MXU operands with f32 accumulation vs. a full-f32 reference:
    # error scales with the K=512 cond contraction, so tolerance is loose
    # but meaningful.
    assert jnp.allclose(out, ref, atol=3e-2, rtol=3e-2), (
        float(jnp.max(jnp.abs(out - ref))))

    print("KERNEL_OK")
</pallas_src>

<mosaic_0001>
module attributes {stable_mosaic.version = 11 : i64} {
  func.func @diffusion_kernel(%arg0: i32, %arg1: memref<8x128xf32, #tpu.memory_space<vmem>>, %arg2: memref<8x512xf32, #tpu.memory_space<vmem>>, %arg3: memref<640x256xbf16, #tpu.memory_space<vmem>>, %arg4: memref<1x256xf32, #tpu.memory_space<vmem>>, %arg5: memref<256x128xbf16, #tpu.memory_space<vmem>>, %arg6: memref<1x128xf32, #tpu.memory_space<vmem>>, %arg7: memref<8x128xf32, #tpu.memory_space<vmem>>) attributes {dimension_semantics = [#tpu.dimension_semantics<parallel>], iteration_bounds = array<i64: 1>, scalar_prefetch = 0 : i64, scratch_operands = 0 : i64, tpu.core_type = #tpu.core_type<tc>, window_params = [{transform_indices = @transform_0, window_bounds = array<i64: 8, 128>}, {transform_indices = @transform_1, window_bounds = array<i64: 8, 512>}, {pipeline_mode = #tpu.pipeline_mode<synchronous>, transform_indices = @transform_2, window_bounds = array<i64: 640, 256>}, {pipeline_mode = #tpu.pipeline_mode<synchronous>, transform_indices = @transform_3, window_bounds = array<i64: 1, 256>}, {pipeline_mode = #tpu.pipeline_mode<synchronous>, transform_indices = @transform_4, window_bounds = array<i64: 256, 128>}, {pipeline_mode = #tpu.pipeline_mode<synchronous>, transform_indices = @transform_5, window_bounds = array<i64: 1, 128>}, {transform_indices = @transform_6, window_bounds = array<i64: 8, 128>}]} {
    %c0 = arith.constant 0 : index
    %c0_0 = arith.constant 0 : index
    %0 = vector.load %arg1[%c0, %c0_0] : memref<8x128xf32, #tpu.memory_space<vmem>>, vector<8x128xf32>
    %1 = arith.truncf %0 : vector<8x128xf32> to vector<8x128xbf16>
    %c0_1 = arith.constant 0 : index
    %c0_2 = arith.constant 0 : index
    %2 = vector.load %arg2[%c0_1, %c0_2] : memref<8x512xf32, #tpu.memory_space<vmem>>, vector<8x512xf32>
    %3 = arith.truncf %2 : vector<8x512xf32> to vector<8x512xbf16>
    %c0_3 = arith.constant 0 : index
    %c0_4 = arith.constant 0 : index
    %4 = vector.load %arg3[%c0_3, %c0_4] : memref<640x256xbf16, #tpu.memory_space<vmem>>, vector<128x256xbf16>
    %cst = arith.constant dense<0.000000e+00> : vector<8x256xf32>
    %5 = tpu.matmul %1, %4, %cst {dimension_numbers = #tpu.dot_dimension_numbers<[1], [0], [0], [1], [0, 0, 1, 1], [], []>} : vector<8x128xbf16>, vector<128x256xbf16>, vector<8x256xf32> -> vector<8x256xf32>
    %c128 = arith.constant 128 : index
    %c0_5 = arith.constant 0 : index
    %6 = vector.load %arg3[%c128, %c0_5] : memref<640x256xbf16, #tpu.memory_space<vmem>>, vector<512x256xbf16>
    %cst_6 = arith.constant dense<0.000000e+00> : vector<8x256xf32>
    %7 = tpu.matmul %3, %6, %cst_6 {dimension_numbers = #tpu.dot_dimension_numbers<[1], [0], [0], [1], [0, 0, 1, 1], [], []>} : vector<8x512xbf16>, vector<512x256xbf16>, vector<8x256xf32> -> vector<8x256xf32>
    %8 = arith.addf %5, %7 : vector<8x256xf32>
    %c0_7 = arith.constant 0 : index
    %c0_8 = arith.constant 0 : index
    %9 = vector.load %arg4[%c0_7, %c0_8] : memref<1x256xf32, #tpu.memory_space<vmem>>, vector<1x256xf32>
    %10 = vector.broadcast %9 : vector<1x256xf32> to vector<8x256xf32>
    %11 = arith.addf %8, %10 : vector<8x256xf32>
    %cst_9 = arith.constant 0.000000e+00 : f32
    %12 = vector.broadcast %cst_9 : f32 to vector<8x256xf32>
    %13 = arith.maximumf %11, %12 : vector<8x256xf32>
    %14 = arith.truncf %13 : vector<8x256xf32> to vector<8x256xbf16>
    %c0_10 = arith.constant 0 : index
    %c0_11 = arith.constant 0 : index
    %15 = vector.load %arg5[%c0_10, %c0_11] : memref<256x128xbf16, #tpu.memory_space<vmem>>, vector<256x128xbf16>
    %cst_12 = arith.constant dense<0.000000e+00> : vector<8x128xf32>
    %16 = tpu.matmul %14, %15, %cst_12 {dimension_numbers = #tpu.dot_dimension_numbers<[1], [0], [0], [1], [0, 0, 1, 1], [], []>} : vector<8x256xbf16>, vector<256x128xbf16>, vector<8x128xf32> -> vector<8x128xf32>
    %c0_13 = arith.constant 0 : index
    %c0_14 = arith.constant 0 : index
    %17 = vector.load %arg6[%c0_13, %c0_14] : memref<1x128xf32, #tpu.memory_space<vmem>>, vector<1x128xf32>
    %18 = vector.broadcast %17 : vector<1x128xf32> to vector<8x128xf32>
    %19 = arith.addf %16, %18 : vector<8x128xf32>
    %c0_15 = arith.constant 0 : index
    %c0_16 = arith.constant 0 : index
    %20 = vector.load %arg7[%c0_15, %c0_16] : memref<8x128xf32, #tpu.memory_space<vmem>>, vector<8x128xf32>
    tpu.vector_store %arg7[%c0_15, %c0_16], %19 {strides = array<i32>} : memref<8x128xf32, #tpu.memory_space<vmem>>, vector<8x128xf32>,
    return
  }
  func.func @transform_0(%arg0: i32) -> (i32, i32) {
    %c0_i32 = arith.constant 0 : i32
    %c0_i32_0 = arith.constant 0 : i32
    return %arg0, %c0_i32 : i32, i32
  }
  func.func @transform_1(%arg0: i32) -> (i32, i32) {
    %c0_i32 = arith.constant 0 : i32
    %c0_i32_0 = arith.constant 0 : i32
    return %arg0, %c0_i32 : i32, i32
  }
  func.func @transform_2(%arg0: i32) -> (i32, i32) {
    %c0_i32 = arith.constant 0 : i32
    %c0_i32_0 = arith.constant 0 : i32
    %c0_i32_1 = arith.constant 0 : i32
    return %c0_i32, %c0_i32_0 : i32, i32
  }
  func.func @transform_3(%arg0: i32) -> (i32, i32) {
    %c0_i32 = arith.constant 0 : i32
    %c0_i32_0 = arith.constant 0 : i32
    %c0_i32_1 = arith.constant 0 : i32
    return %c0_i32, %c0_i32_0 : i32, i32
  }
  func.func @transform_4(%arg0: i32) -> (i32, i32) {
    %c0_i32 = arith.constant 0 : i32
    %c0_i32_0 = arith.constant 0 : i32
    %c0_i32_1 = arith.constant 0 : i32
    return %c0_i32, %c0_i32_0 : i32, i32
  }
  func.func @transform_5(%arg0: i32) -> (i32, i32) {
    %c0_i32 = arith.constant 0 : i32
    %c0_i32_0 = arith.constant 0 : i32
    %c0_i32_1 = arith.constant 0 : i32
    return %c0_i32, %c0_i32_0 : i32, i32
  }
  func.func @transform_6(%arg0: i32) -> (i32, i32) {
    %c0_i32 = arith.constant 0 : i32
    %c0_i32_0 = arith.constant 0 : i32
    return %arg0, %c0_i32 : i32, i32
  }
}

</mosaic_0001>

<bundles_post_ra>
// kernel: tpu_custom_call.1
= control target key start
LH: loop header
LB: loop body
LE: loop exit
PB: predicated region body
PF: predicated region fallthrough
CT: control target
= control target key end

     0   :  { %11 = vsyncpa [#allocation3], 0  ;;  %s1339_s0 = inlined_call_operand.hbm [shape: f32[8,128], index: 0, kind: input, shape index: {}]   ;;  %s1340_s1 = inlined_call_operand.hbm [shape: f32[8,512], index: 1, kind: input, shape index: {}]   ;;  %s1341_s2 = inlined_call_operand.hbm [shape: bf16[640,256], index: 2, kind: input, shape index: {}]   ;;  %s1342_s3 = inlined_call_operand.vmem [shape: f32[1,256], index: 3, kind: input, shape index: {}]   ;;  %s1343_s4 = inlined_call_operand.hbm [shape: bf16[256,128], index: 4, kind: input, shape index: {}]   ;;  %s1344_s5 = inlined_call_operand.vmem [shape: f32[1,128], index: 5, kind: input, shape index: {}]   ;;  %s1345_s6 = inlined_call_operand.hbm [shape: f32[8,128], index: 6, kind: output, shape index: {}]  }
   0x1   :  { %12 = vsyncpa [#allocation6], 0 }
   0x2   :  { %13 = vsyncpa [#allocation9], 0 }
   0x3   :  { %14 = vsyncpa [#allocation4], 0  ;;  %s1273_s21 = smov [#allocation5]   ;;  %s1274_s23 = smov [#allocation2]  }
   0x4   :  { %s31_s22 = sshll.u32 %s1273_s21, 4  ;;  %s21_s24 = sshll.u32 %s1274_s23, 4  ;;  %s32_s22 = int_to_ptr.vmem [resolvable:$true] %s31_s22  ;;  %s22_s24 = int_to_ptr.vmem [resolvable:$true] %s21_s24 }
   0x5   :  { %s1173_s25 = scalar_lea.vmem %s32_s22, 512  ;;  %p1178_p1 = scmp.lt.s32.totalorder %s32_s22, %s32_s22 }
   0x6   :  { %p1174_p0 = scmp.ne.s32.totalorder %s32_s22, %s1173_s25  ;;  %p1179_p2 = scmp.lt.s32.totalorder %s1173_s25, %s1173_s25 }
   0x8   :  { %p1180_p3 = por %p1179_p2, %p1178_p1 }
   0xa   :  { %p1181_p4 = pnand %p1180_p3, %p1174_p0 }
   0xc   :  { %1184 = shalt.err (!%p1181_p4)
}
   0xd   :  { %34 = dma.hbm_to_vmem [thread:$0]  %s1340_s1, 512, %s32_s22, [#allocation6]  }
   0xe   :  { %s1193_s28 = scalar_lea.vmem %s22_s24, 128  ;;  %p1198_p6 = scmp.lt.s32.totalorder %s22_s24, %s22_s24 }
   0xf   :  { %p1194_p5 = scmp.ne.s32.totalorder %s22_s24, %s1193_s28  ;;  %p1199_p7 = scmp.lt.s32.totalorder %s1193_s28, %s1193_s28 }
  0x11   :  { %p1200_p8 = por %p1199_p7, %p1198_p6 }
  0x13   :  { %p1201_p9 = pnand %p1200_p8, %p1194_p5 }
  0x15   :  { %1204 = shalt.err (!%p1201_p9)
}
  0x16   :  { %24 = dma.hbm_to_vmem [thread:$0]  %s1339_s0, 128, %s22_s24, [#allocation3]  }
  0x17   :  { %s1275_s7 = smov [#allocation7]  }
  0x18   :  { %s40_s8 = sshll.u32 %s1275_s7, 4  ;;  %s41_s8 = int_to_ptr.vmem [resolvable:$true] %s40_s8 }
  0x19   :  { %s1213_s9 = scalar_lea.vmem %s41_s8, 10240  ;;  %p1218_p11 = scmp.lt.s32.totalorder %s41_s8, %s41_s8 }
  0x1a   :  { %p1214_p10 = scmp.ne.s32.totalorder %s41_s8, %s1213_s9  ;;  %p1219_p12 = scmp.lt.s32.totalorder %s1213_s9, %s1213_s9 }
  0x1c   :  { %p1220_p13 = por %p1219_p12, %p1218_p11 }
  0x1e   :  { %p1221_p0 = pnand %p1220_p13, %p1214_p10 }
  0x20   :  { %1224 = shalt.err (!%p1221_p0)
}
  0x21   :  { %s1276_s1 = smov 128   ;;  %s1277_s10 = smov 8  }
  0x22   :  { %46 = dma.hbm_to_vmem [thread:$0]  %s1341_s2, 10240, %s41_s8, [#allocation6], %s1276_s1, %s1276_s1, %s1277_s10  }
  0x23   :  { %s1278_s13 = smov [#allocation8]  }
  0x24   :  { %s54_s14 = sshll.u32 %s1278_s13, 4  ;;  %s55_s14 = int_to_ptr.vmem [resolvable:$true] %s54_s14 }
  0x25   :  { %s1233_s0 = scalar_lea.vmem %s55_s14, 2048  ;;  %p1238_p2 = scmp.lt.s32.totalorder %s55_s14, %s55_s14 }
  0x26   :  { %p1234_p1 = scmp.ne.s32.totalorder %s55_s14, %s1233_s0  ;;  %p1239_p3 = scmp.lt.s32.totalorder %s1233_s0, %s1233_s0 }
  0x28   :  { %p1240_p4 = por %p1239_p3, %p1238_p2 }
  0x2a   :  { %p1241_p5 = pnand %p1240_p4, %p1234_p1 }
  0x2c   :  { %1244 = shalt.err (!%p1241_p5)
}
  0x2d   :  { %s1279_s15 = smov 64   ;;  %s1280_s16 = smov 4  }
  0x2e   :  { %60 = dma.hbm_to_vmem [thread:$0]  %s1343_s4, 2048, %s55_s14, [#allocation9], %s1279_s15, %s1279_s15, %s1280_s16  }
  0x2f   :  { %1265 = dma.done.wait [#allocation3], 128  }
  0x30   :  { %1266 = vsyncadd [#allocation3], 4294967168 }
  0x31   :  { %1267 = dma.done.wait [#allocation6], 10752  }
  0x32   :  { %1268 = vsyncadd [#allocation6], 4294956544 }
  0x33   :  { %1269 = dma.done.wait [#allocation9], 2048  }
  0x34   :  { %1270 = vsyncadd [#allocation9], 4294965248  ;;  %v1029_v0 = vld [vmem:[#allocation7 + $0xf4] ss:$8 sps:$4 sm:$0xff]   ;;  %v1033_v2 = vld [vmem:[#allocation7 + $0xf0] ss:$8 sps:$4 sm:$0xff]  }
  0x35   :  { %v1031_v1 = vld [vmem:[#allocation7 + $0x1f4] ss:$8 sps:$4 sm:$0xff]   ;;  %486 = vmatprep.subr.bf16.mxu0 %v1029_v0  ;;  %v1034_v3 = vld [vmem:[#allocation7 + $0x1f0] ss:$8 sps:$4 sm:$0xff]   ;;  %v1035_v4 = vld [vmem:[#allocation7 + $0xe4] ss:$8 sps:$4 sm:$0xff]  }
  0x36   :  { %527 = vmatprep.subr.bf16.mxu1 %v1031_v1  ;;  %487 = vmatpush1.bf16.msra.mxu0 %v1033_v2  ;;  %v1037_v5 = vld [vmem:[#allocation7 + $0x1e4] ss:$8 sps:$4 sm:$0xff]   ;;  %v1039_v6 = vld [vmem:[#allocation7 + $0xe0] ss:$8 sps:$4 sm:$0xff]   ;;  %v1041_v8 = vld [vmem:[#allocation7 + $0xd4] ss:$8 sps:$4 sm:$0xff]  }
  0x37   :  { %528 = vmatpush1.bf16.msra.mxu1 %v1034_v3  ;;  %488 = vmatprep.subr.bf16.mxu0 %v1035_v4  ;;  %v1040_v7 = vld [vmem:[#allocation7 + $0x1e0] ss:$8 sps:$4 sm:$0xff]   ;;  %v1043_v9 = vld [vmem:[#allocation7 + $0x1d4] ss:$8 sps:$4 sm:$0xff]   ;;  %v1045_v10 = vld [vmem:[#allocation7 + $0xd0] ss:$8 sps:$4 sm:$0xff]  }
  0x38   :  { %529 = vmatprep.subr.bf16.mxu1 %v1037_v5  ;;  %v1046_v11 = vld [vmem:[#allocation7 + $0x1d0] ss:$8 sps:$4 sm:$0xff]   ;;  %v1047_v12 = vld [vmem:[#allocation7 + $0xc4] ss:$8 sps:$4 sm:$0xff]   ;;  %v1051_v14 = vld [vmem:[#allocation7 + $0xc0] ss:$8 sps:$4 sm:$0xff]  }
  0x39   :  { %v1049_v13 = vld [vmem:[#allocation7 + $0x1c4] ss:$8 sps:$4 sm:$0xff]   ;;  %v1052_v15 = vld [vmem:[#allocation7 + $0x1c0] ss:$8 sps:$4 sm:$0xff]   ;;  %v1053_v16 = vld [vmem:[#allocation7 + $0xb4] ss:$8 sps:$4 sm:$0xff]  }
  0x3a   :  { %489 = vmatpush1.bf16.msra.mxu0 %v1039_v6  ;;  %v1055_v17 = vld [vmem:[#allocation7 + $0x1b4] ss:$8 sps:$4 sm:$0xff]   ;;  %v1057_v18 = vld [vmem:[#allocation7 + $0xb0] ss:$8 sps:$4 sm:$0xff]   ;;  %v1059_v20 = vld [vmem:[#allocation7 + $0xa4] ss:$8 sps:$4 sm:$0xff]  }
  0x3b   :  { %530 = vmatpush1.bf16.msra.mxu1 %v1040_v7  ;;  %490 = vmatprep.subr.bf16.mxu0 %v1041_v8  ;;  %v1058_v19 = vld [vmem:[#allocation7 + $0x1b0] ss:$8 sps:$4 sm:$0xff]   ;;  %v1061_v21 = vld [vmem:[#allocation7 + $0x1a4] ss:$8 sps:$4 sm:$0xff]   ;;  %v1063_v22 = vld [vmem:[#allocation7 + $0xa0] ss:$8 sps:$4 sm:$0xff]  }
  0x3c   :  { %531 = vmatprep.subr.bf16.mxu1 %v1043_v9  ;;  %v1064_v23 = vld [vmem:[#allocation7 + $0x1a0] ss:$8 sps:$4 sm:$0xff]   ;;  %v1065_v24 = vld [vmem:[#allocation7 + $0x94] ss:$8 sps:$4 sm:$0xff]   ;;  %v1069_v26 = vld [vmem:[#allocation7 + $0x90] ss:$8 sps:$4 sm:$0xff]  }
  0x3d   :  { %v1067_v25 = vld [vmem:[#allocation7 + $0x194] ss:$8 sps:$4 sm:$0xff]   ;;  %v1070_v27 = vld [vmem:[#allocation7 + $0x190] ss:$8 sps:$4 sm:$0xff]   ;;  %v1071_v28 = vld [vmem:[#allocation7 + $0x84] ss:$8 sps:$4 sm:$0xff]  }
  0x3e   :  { %491 = vmatpush1.bf16.msra.mxu0 %v1045_v10  ;;  %v1073_v29 = vld [vmem:[#allocation7 + $0x184] ss:$8 sps:$4 sm:$0xff]   ;;  %v1075_v30 = vld [vmem:[#allocation7 + $0x80] ss:$8 sps:$4 sm:$0xff]   ;;  %v1077_v32 = vld [vmem:[#allocation7 + $0x174] ss:$8 sps:$4 sm:$0xff]  }
  0x3f   :  { %532 = vmatpush1.bf16.msra.mxu1 %v1046_v11  ;;  %492 = vmatprep.subr.bf16.mxu0 %v1047_v12  ;;  %v1076_v31 = vld [vmem:[#allocation7 + $0x180] ss:$8 sps:$4 sm:$0xff]   ;;  %v1079_v33 = vld [vmem:[#allocation7 + $0x274] ss:$8 sps:$4 sm:$0xff]   ;;  %v1081_v34 = vld [vmem:[#allocation7 + $0x170] ss:$8 sps:$4 sm:$0xff]  }
  0x40   :  { %533 = vmatprep.subr.bf16.mxu1 %v1049_v13  ;;  %v1082_v35 = vld [vmem:[#allocation7 + $0x270] ss:$8 sps:$4 sm:$0xff]   ;;  %v1083_v36 = vld [vmem:[#allocation7 + $0x164] ss:$8 sps:$4 sm:$0xff]   ;;  %v1087_v38 = vld [vmem:[#allocation7 + $0x160] ss:$8 sps:$4 sm:$0xff]  }
  0x41   :  { %v1085_v37 = vld [vmem:[#allocation7 + $0x264] ss:$8 sps:$4 sm:$0xff]   ;;  %v1088_v39 = vld [vmem:[#allocation7 + $0x260] ss:$8 sps:$4 sm:$0xff]   ;;  %v1089_v40 = vld [vmem:[#allocation7 + $0x154] ss:$8 sps:$4 sm:$0xff]  }
  0x42   :  { %493 = vmatpush1.bf16.msra.mxu0 %v1051_v14  ;;  %v1091_v41 = vld [vmem:[#allocation7 + $0x254] ss:$8 sps:$4 sm:$0xff]   ;;  %v1093_v42 = vld [vmem:[#allocation7 + $0x150] ss:$8 sps:$4 sm:$0xff]   ;;  %v1095_v44 = vld [vmem:[#allocation7 + $0x144] ss:$8 sps:$4 sm:$0xff]  }
  0x43   :  { %534 = vmatpush1.bf16.msra.mxu1 %v1052_v15  ;;  %494 = vmatprep.subr.bf16.mxu0 %v1053_v16  ;;  %v1094_v43 = vld [vmem:[#allocation7 + $0x250] ss:$8 sps:$4 sm:$0xff]   ;;  %v1097_v45 = vld [vmem:[#allocation7 + $0x244] ss:$8 sps:$4 sm:$0xff]   ;;  %v1099_v47 = vld [vmem:[#allocation7 + $0x140] ss:$8 sps:$4 sm:$0xff]  }
  0x44   :  { %535 = vmatprep.subr.bf16.mxu1 %v1055_v17  ;;  %v79_v46 = vld [vmem:[#allocation5 + $0x8] sm:$0xff]  ;;  %v81_v50 = vld [vmem:[#allocation5 + $0x18] sm:$0xff]  ;;  %v78_v4 = vld [vmem:[#allocation5] sm:$0xff]  ;;  %v1281_v12 = vmov 0   ;;  %s1282_s20 = smov [#allocation10]  }
  0x45   :  { %v1100_v48 = vld [vmem:[#allocation7 + $0x240] ss:$8 sps:$4 sm:$0xff]   ;;  %v83_v49 = vpack.c.bf16 %v79_v46, %v79_v46  ;;  %v1101_v51 = vld [vmem:[#allocation7 + $0x134] ss:$8 sps:$4 sm:$0xff]   ;;  %v85_v52 = vpack.c.bf16 %v81_v50, %v81_v50  ;;  %v1105_v54 = vld [vmem:[#allocation7 + $0x130] ss:$8 sps:$4 sm:$0xff]   ;;  %v82_v8 = vpack.c.bf16 %v78_v4, %v78_v4 }
  0x46   :  { %495 = vmatpush1.bf16.msra.mxu0 %v1057_v18  ;;  %v1103_v53 = vld [vmem:[#allocation7 + $0x234] ss:$8 sps:$4 sm:$0xff]   ;;  %v1106_v55 = vld [vmem:[#allocation7 + $0x230] ss:$8 sps:$4 sm:$0xff]   ;;  %v1107_v56 = vld [vmem:[#allocation7 + $0x124] ss:$8 sps:$4 sm:$0xff]  }
  0x47   :  { %536 = vmatpush1.bf16.msra.mxu1 %v1058_v19  ;;  %496 = vmatprep.subr.bf16.mxu0 %v1059_v20  ;;  %v1109_v57 = vld [vmem:[#allocation7 + $0x224] ss:$8 sps:$4 sm:$0xff]   ;;  %v1111_v58 = vld [vmem:[#allocation7 + $0x120] ss:$8 sps:$4 sm:$0xff]   ;;  %v1113_v60 = vld [vmem:[#allocation7 + $0x114] ss:$8 sps:$4 sm:$0xff]  }
  0x48   :  { %537 = vmatprep.subr.bf16.mxu1 %v1061_v21  ;;  %518 = vmatprep.mubr.bf16.mxu0 %v83_v49  ;;  %v1112_v59 = vld [vmem:[#allocation7 + $0x220] ss:$8 sps:$4 sm:$0xff]   ;;  %v1115_v61 = vld [vmem:[#allocation7 + $0x214] ss:$8 sps:$4 sm:$0xff]   ;;  %v1117_v62 = vld [vmem:[#allocation7 + $0x110] ss:$8 sps:$4 sm:$0xff]  }
  0x49   :  { %559 = vmatprep.mubr.bf16.mxu1 %v85_v52  ;;  %v1118_v63 = vld [vmem:[#allocation7 + $0x210] ss:$8 sps:$4 sm:$0xff]   ;;  %v1119_v0 = vld [vmem:[#allocation7 + $0x104] ss:$8 sps:$4 sm:$0xff]   ;;  %v1123_v2 = vld [vmem:[#allocation7 + $0x100] ss:$8 sps:$4 sm:$0xff]  }
  0x4a   :  { %497 = vmatpush1.bf16.msra.mxu0 %v1063_v22  ;;  %v1121_v1 = vld [vmem:[#allocation7 + $0x204] ss:$8 sps:$4 sm:$0xff]   ;;  %v1124_v3 = vld [vmem:[#allocation7 + $0x200] ss:$8 sps:$4 sm:$0xff]   ;;  %v80_v5 = vld [vmem:[#allocation5 + $0x10] sm:$0xff]  ;;  %s889_s21 = sshll.u32 %s1282_s20, 4  ;;  %s890_s21 = int_to_ptr.vmem [resolvable:$true] %s889_s21 }
  0x4b   :  { %538 = vmatpush1.bf16.msra.mxu1 %v1064_v23  ;;  %498 = vmatprep.subr.bf16.mxu0 %v1065_v24  ;;  %v1127_v6 = vld [vmem:[#allocation7 + $0x74] ss:$8 sps:$4 sm:$0xff]   ;;  %v1125_v7 = vld [vmem:[#allocation7 + $0x70] ss:$8 sps:$4 sm:$0xff]   ;;  %v84_v9 = vpack.c.bf16 %v80_v5, %v80_v5  ;;  %v1130_v10 = vld [vmem:[#allocation7 + $0x64] ss:$8 sps:$4 sm:$0xff]   ;;  %p1250_p7 = scmp.lt.s32.totalorder %s890_s21, %s890_s21 }
  0x4c   :  { %539 = vmatprep.subr.bf16.mxu1 %v1067_v25  ;;  %v1128_v11 = vld [vmem:[#allocation7 + $0x60] ss:$8 sps:$4 sm:$0xff]   ;;  %v1133_v13 = vld [vmem:[#allocation7 + $0x54] ss:$8 sps:$4 sm:$0xff]   ;;  %v1131_v14 = vld [vmem:[#allocation7 + $0x50] ss:$8 sps:$4 sm:$0xff]  }
  0x4d   :  { %v1136_v15 = vld [vmem:[#allocation7 + $0x44] ss:$8 sps:$4 sm:$0xff]   ;;  %v1134_v16 = vld [vmem:[#allocation7 + $0x40] ss:$8 sps:$4 sm:$0xff]   ;;  %v1139_v17 = vld [vmem:[#allocation7 + $0x34] ss:$8 sps:$4 sm:$0xff]  }
  0x4e   :  { %499 = vmatpush1.bf16.msra.mxu0 %v1069_v26  ;;  %v1137_v18 = vld [vmem:[#allocation7 + $0x30] ss:$8 sps:$4 sm:$0xff]   ;;  %v1142_v19 = vld [vmem:[#allocation7 + $0x24] ss:$8 sps:$4 sm:$0xff]   ;;  %v1140_v20 = vld [vmem:[#allocation7 + $0x20] ss:$8 sps:$4 sm:$0xff]  }
  0x4f   :  { %540 = vmatpush1.bf16.msra.mxu1 %v1070_v27  ;;  %500 = vmatprep.subr.bf16.mxu0 %v1071_v28  ;;  %v1145_v21 = vld [vmem:[#allocation7 + $0x14] ss:$8 sps:$4 sm:$0xff]   ;;  %v1143_v22 = vld [vmem:[#allocation7 + $0x10] ss:$8 sps:$4 sm:$0xff]   ;;  %v1148_v23 = vld [vmem:[#allocation7 + $0x4] ss:$8 sps:$4 sm:$0xff]  }
  0x50   :  { %541 = vmatprep.subr.bf16.mxu1 %v1073_v29  ;;  %v1146_v24 = vld [vmem:[#allocation7] ss:$8 sps:$4 sm:$0xff]   ;;  %v76_v25 = vld [vmem:[#allocation2] sm:$0xff]  ;;  %v1151_v29 = vld [vmem:[#allocation8 + $0x70] sm:$0xff]   ;;  %s1245_s22 = scalar_lea.vmem %s890_s21, 128 }
  0x51   :  { %v77_v26 = vpack.c.bf16 %v76_v25, %v76_v25  ;;  %v1149_v27 = vld [vmem:[#allocation8 + $0x78] sm:$0xff]   ;;  %p1246_p6 = scmp.ne.s32.totalorder %s890_s21, %s1245_s22  ;;  %p1251_p8 = scmp.lt.s32.totalorder %s1245_s22, %s1245_s22 }
  0x52   :  { %501 = vmatpush1.bf16.msra.mxu0 %v1075_v30  ;;  %v1150_v28 = vld [vmem:[#allocation8 + $0x38] sm:$0xff]   ;;  %v1152_v30 = vld [vmem:[#allocation8 + $0x30] sm:$0xff]  }
  0x53   :  { %542 = vmatpush1.bf16.msra.mxu1 %v1076_v31  ;;  %502 = vmatprep.subr.bf16.mxu0 %v1077_v32  ;;  %v1153_v31 = vld [vmem:[#allocation8 + $0x68] sm:$0xff]   ;;  %p1252_p9 = por %p1251_p8, %p1250_p7 }
  0x54   :  { %543 = vmatprep.subr.bf16.mxu1 %v1079_v33  ;;  %v1154_v32 = vld [vmem:[#allocation8 + $0x28] sm:$0xff]   ;;  %v1155_v33 = vld [vmem:[#allocation8 + $0x60] sm:$0xff]  }
  0x55   :  { %p1253_p10 = pnand %p1252_p9, %p1246_p6 }
  0x56   :  { %503 = vmatpush2.bf16.msra.mxu0 %v1081_v34  ;;  %v1156_v34 = vld [vmem:[#allocation8 + $0x20] sm:$0xff]  }
  0x57   :  { %544 = vmatpush2.bf16.msra.mxu1 %v1082_v35  ;;  %504 = vmatprep.subr.bf16.mxu0 %v1083_v36  ;;  %v1157_v35 = vld [vmem:[#allocation8 + $0x58] sm:$0xff]  }
  0x58   :  { %545 = vmatprep.subr.bf16.mxu1 %v1085_v37  ;;  %v1158_v36 = vld [vmem:[#allocation8 + $0x18] sm:$0xff]   ;;  %v1159_v37 = vld [vmem:[#allocation8 + $0x50] sm:$0xff]  }
  0x5a   :  { %505 = vmatpush2.bf16.msra.mxu0 %v1087_v38  ;;  %v1160_v38 = vld [vmem:[#allocation8 + $0x10] sm:$0xff]  }
  0x5b   :  { %546 = vmatpush2.bf16.msra.mxu1 %v1088_v39  ;;  %506 = vmatprep.subr.bf16.mxu0 %v1089_v40  ;;  %v1161_v39 = vld [vmem:[#allocation8 + $0x48] sm:$0xff]  }
  0x5c   :  { %547 = vmatprep.subr.bf16.mxu1 %v1091_v41  ;;  %v1162_v40 = vld [vmem:[#allocation8 + $0x8] sm:$0xff]   ;;  %v1163_v41 = vld [vmem:[#allocation8 + $0x40] sm:$0xff]  }
  0x5e   :  { %507 = vmatpush2.bf16.msra.mxu0 %v1093_v42  ;;  %v1164_v42 = vld [vmem:[#allocation8] sm:$0xff]  }
  0x5f   :  { %548 = vmatpush2.bf16.msra.mxu1 %v1094_v43  ;;  %508 = vmatprep.subr.bf16.mxu0 %v1095_v44 }
  0x60   :  { %549 = vmatprep.subr.bf16.mxu1 %v1097_v45 }
  0x62   :  { %509 = vmatpush2.bf16.msra.mxu0 %v1099_v47 }
  0x63   :  { %550 = vmatpush2.bf16.msra.mxu1 %v1100_v48  ;;  %510 = vmatprep.subr.bf16.mxu0 %v1101_v51  ;;  %v691_v51 = vlaneseq }
  0x64   :  { %551 = vmatprep.subr.bf16.mxu1 %v1103_v53 }
  0x65   :  { %v692_v52 = vshrl.u32 %v691_v51, 7 }
  0x66   :  { %511 = vmatpush2.bf16.msra.mxu0 %v1105_v54  ;;  %v689_v54 = vld [vmem:[%s1342_s3] sm:$0x3] }
  0x67   :  { %552 = vmatpush2.bf16.msra.mxu1 %v1106_v55  ;;  %512 = vmatprep.subr.bf16.mxu0 %v1107_v56  ;;  %v693_v53 = vsub.s32 0, %v692_v52  ;;  %v697_v55 = vsub.s32 1, %v692_v52 }
  0x68   :  { %553 = vmatprep.subr.bf16.mxu1 %v1109_v57 }
  0x69   :  { %v694_v57 = vrot.slane %v689_v54, %v693_v53 }
  0x6a   :  { %513 = vmatpush2.bf16.msra.mxu0 %v1111_v58 }
  0x6b   :  { %554 = vmatpush2.bf16.msra.mxu1 %v1112_v59  ;;  %514 = vmatprep.subr.bf16.mxu0 %v1113_v60 }
  0x6c   :  { %555 = vmatprep.subr.bf16.mxu1 %v1115_v61  ;;  %v698_v61 = vrot.slane %v689_v54, %v697_v55 }
  0x6e   :  { %515 = vmatpush2.bf16.msra.mxu0 %v1117_v62 }
  0x6f   :  { %556 = vmatpush2.bf16.msra.mxu1 %v1118_v63  ;;  %516 = vmatprep.subr.bf16.mxu0 %v1119_v0 }
  0x70   :  { %557 = vmatprep.subr.bf16.mxu1 %v1121_v1 }
  0x72   :  { %517 = vmatpush2.bf16.msra.mxu0 %v1123_v2 }
  0x73   :  { %558 = vmatpush2.bf16.msra.mxu1 %v1124_v3  ;;  %648 = vmatprep.subr.bf16.mxu0 %v1127_v6 }
  0x74   :  { %997 = vmatprep.subr.bf16.mxu1 %v1149_v27 }
  0x75   :  { %519 = vmatmul.mubr.bf16.vlgmr.msra.gmra.mxu0 %v82_v8 }
  0x76   :  { %560 = vmatmul.mubr.bf16.vlgmr.msra.gmra.mxu1 %v84_v9  ;;  %649 = vmatpush1.bf16.msra.mxu0 %v1125_v7  ;;  %v980_v9 = vld [vmem:[%s1344_s5] ss:$0 sm:$0xff] }
  0x77   :  { %680 = vmatprep.mubr.bf16.mxu0 %v1281_v12  ;;  %650 = vmatprep.subr.bf16.mxu0 %v1130_v10 }
  0x78   :  { %998 = vmatpush3.bf16.msra.mxu1 %v1150_v28 }
  0x79   :  { %999 = vmatprep.subr.bf16.mxu1 %v1151_v29 }
  0x7a   :  { %651 = vmatpush1.bf16.msra.mxu0 %v1128_v11 }
  0x7b   :  { %652 = vmatprep.subr.bf16.mxu0 %v1133_v13 }
  0x7c   :  { %1000 = vmatpush3.bf16.msra.mxu1 %v1152_v30 }
  0x7d   :  { %1001 = vmatprep.subr.bf16.mxu1 %v1153_v31 }
  0x7e   :  { %653 = vmatpush1.bf16.msra.mxu0 %v1131_v14 }
  0x7f   :  { %654 = vmatprep.subr.bf16.mxu0 %v1136_v15 }
  0x80   :  { %1002 = vmatpush3.bf16.msra.mxu1 %v1154_v32 }
  0x81   :  { %1003 = vmatprep.subr.bf16.mxu1 %v1155_v33 }
  0x82   :  { %655 = vmatpush1.bf16.msra.mxu0 %v1134_v16 }
  0x83   :  { %656 = vmatprep.subr.bf16.mxu0 %v1139_v17 }
  0x84   :  { %1004 = vmatpush3.bf16.msra.mxu1 %v1156_v34 }
  0x85   :  { %1005 = vmatprep.subr.bf16.mxu1 %v1157_v35 }
  0x86   :  { %657 = vmatpush1.bf16.msra.mxu0 %v1137_v18 }
  0x87   :  { %658 = vmatprep.subr.bf16.mxu0 %v1142_v19 }
  0x88   :  { %1006 = vmatpush3.bf16.msra.mxu1 %v1158_v36 }
  0x89   :  { %1007 = vmatprep.subr.bf16.mxu1 %v1159_v37 }
  0x8a   :  { %659 = vmatpush1.bf16.msra.mxu0 %v1140_v20 }
  0x8b   :  { %660 = vmatprep.subr.bf16.mxu0 %v1145_v21 }
  0x8c   :  { %1008 = vmatpush3.bf16.msra.mxu1 %v1160_v38 }
  0x8d   :  { %1009 = vmatprep.subr.bf16.mxu1 %v1161_v39 }
  0x8e   :  { %661 = vmatpush1.bf16.msra.mxu0 %v1143_v22 }
  0x8f   :  { %662 = vmatprep.subr.bf16.mxu0 %v1148_v23 }
  0x90   :  { %1010 = vmatpush3.bf16.msra.mxu1 %v1162_v40 }
  0x91   :  { %1011 = vmatprep.subr.bf16.mxu1 %v1163_v41 }
  0x92   :  { %663 = vmatpush1.bf16.msra.mxu0 %v1146_v24 }
  0x94   :  { %1012 = vmatpush3.bf16.msra.mxu1 %v1164_v42 }
  0x95   :  { %681 = vmatmul.mubr.bf16.vlgmr.msra.gmra.mxu0 %v77_v26 }
 0x135   :  { %v520_v43 = vpop.f32.mrf.mxu0 }
 0x136   :  { %v561_v44 = vpop.f32.mrf.mxu1 }
 0x137   :  { %v522_v45 = vpop.f32.mrf.mxu0  ;;  %v562_v56 = vadd.f32 %v561_v44, %v520_v43 }
 0x138   :  { %v563_v46 = vpop.f32.mrf.mxu1 }
 0x139   :  { %v524_v47 = vpop.f32.mrf.mxu0  ;;  %v564_v59 = vadd.f32 %v563_v46, %v522_v45 }
 0x13a   :  { %v565_v48 = vpop.f32.mrf.mxu1 }
 0x13b   :  { %v525_v49 = vpop.f32.mrf.mxu0 }
 0x13c   :  { %v566_v50 = vpop.f32.mrf.mxu1 }
 0x155   :  { %v682_v58 = vpop.f32.mrf.mxu0 }
 0x156   :  { %v683_v60 = vadd.f32 %v682_v58, %v562_v56 }
 0x157   :  { %v684_v62 = vpop.f32.mrf.mxu0 }
 0x158   :  { %v701_v63 = vadd.f32 %v694_v57, %v683_v60  ;;  %v685_v0 = vadd.f32 %v684_v62, %v564_v59 }
 0x159   :  { %v686_v1 = vpop.f32.mrf.mxu0 }
 0x15a   :  { %v702_v2 = vadd.f32 %v698_v61, %v685_v0  ;;  %v703_v3 = vmax.f32 %v701_v63, 0.0 }
 0x15b   :  { %v687_v4 = vpop.f32.mrf.mxu0 }
 0x15c   :  { %v704_v5 = vmax.f32 %v702_v2, 0.0  ;;  %v705_v7 = vpack.c.bf16 %v703_v3, %v703_v3 }
 0x15e   :  { %v706_v6 = vpack.c.bf16 %v704_v5, %v704_v5 }
 0x160   :  { %874 = vmatprep.mubr.bf16.mxu1 %v706_v6 }
 0x161   :  { %875 = vmatmul.mubr.bf16.vlgmr.msra.gmra.mxu1 %v705_v7 }
 0x221   :  { %v1013_v8 = vpop.f32.mrf.mxu1 }
 0x223   :  { %v1014_v10 = vpop.f32.mrf.mxu1 }
 0x224   :  { %v1015_v11 = vadd.f32 %v1014_v10, %v1013_v8 }
 0x225   :  { %v1016_v12 = vpop.f32.mrf.mxu1 }
 0x226   :  { %v877_v13 = vadd.f32 %v1015_v11, %v980_v9 }
 0x227   :  { %v1017_v14 = vpop.f32.mrf.mxu1 }
 0x228   :  { %882 = vst [vmem:[#allocation10] sm:$0xff] %v877_v13 }
 0x229   :  { %1256 = shalt.err (!%p1253_p10)
}
 0x22a   :  { %892 = dma.vmem_to_hbm [thread:$0]  %s890_s21, 128, %s1345_s6, [#allocation4]  }
 0x22b   :  { %1271 = dma.done.wait [#allocation4], 128  }
 0x22c   :  { %1272 = vsyncadd [#allocation4], 4294967168 }
 0x22d   :  { %896 = vsyncpa [#allocation3], 1 }
 0x22e   :  { %897 = vsyncpa [#allocation6], 1 }
 0x22f   :  { %898 = vsyncpa [#allocation9], 1 }
 0x230   :  { %899 = vsyncpa [#allocation4], 1 }

</bundles_post_ra>
